<compile_context>
chip_gen: v7x
topology: tpu7x:2x2x1
jax: 0.10.0
libtpu: 0.0.40
codegen_flags: <defaults>
</compile_context>

<pallas_src>
import numpy as np
import jax
import jax.numpy as jnp
from jax.experimental import pallas as pl
from jax.experimental.pallas import tpu as pltpu

EPS = 1e-5                      # torch GroupNorm default
MATMUL_DTYPE = jnp.bfloat16     # MXU input dtype for the 1x1 conv (f32 accumulation on MXU)


def class_attn_kernel(x_ref, amat_ref, wconv_ref, bconv_ref, g2_ref, b2_ref, o_ref):
    """One batch element.  x_ref/o_ref: (C, HW); amat: (C, C) f32; wconv: (C, C) bf16;
    bconv/g2/b2: (C, 1) f32."""
    A = amat_ref[...]                                     # (C, C) group-averaging matrix

    def gn_scale_shift(z, gamma, beta):
        # Returns per-channel (scale, shift) so that GroupNorm(z) == z*scale + shift.
        # Sum and sum-of-squares are stacked into one (C, 2) operand -> ONE small matmul for the
        # group reduction instead of two lane-width-1 matmuls.
        stats = jnp.concatenate(
            [jnp.sum(z, axis=-1, keepdims=True),
             jnp.sum(z * z, axis=-1, keepdims=True)], axis=-1)          # (C, 2)
        g = jnp.dot(A, stats, preferred_element_type=jnp.float32)       # (C, 2) group E[z], E[z^2]
        mu = g[:, 0:1]
        var = jnp.maximum(g[:, 1:2] - mu * mu, 0.0)                     # biased var (torch GN)
        scale = jax.lax.rsqrt(var + EPS) * gamma
        shift = beta - mu * scale
        return scale, shift

    # --- GroupNorm 1: affine (gamma1/beta1) is pre-folded into wconv/bconv, so only the raw
    #     normalization is applied.  All stats / elementwise math stays in f32 (v5e VPU: no bf16).
    x = x_ref[...]
    s1, t1 = gn_scale_shift(x, 1.0, 0.0)
    xn = x * s1 + t1                                                    # (C, HW)

    # --- 1x1 conv.  gamma1, beta1 and the softmax-derived 1/sqrt(C) channel scale are folded
    #     into wconv/bconv.  bf16 at the MXU inputs only, f32 accumulation. ---
    y = jnp.dot(wconv_ref[...], xn.astype(wconv_ref.dtype),
                preferred_element_type=jnp.float32) + bconv_ref[...]    # (C, HW)

    # --- GroupNorm 2 + residual; x re-read at the store to keep its live range short. ---
    s2, t2 = gn_scale_shift(y, g2_ref[...], b2_ref[...])
    o_ref[...] = (y * s2 + (t2 + x_ref[...])).astype(o_ref.dtype)


def class_attn_forward(x, cls_vec, params):
    """ClassAttn forward.  `cls_vec` and the q/k parameters are accepted for API parity with the
    PyTorch module, but they provably do not affect the forward output (see header)."""
    del cls_vec  # softmax(q k^T) rows sum to 1 -> per-channel scale == 1/sqrt(C), folded below
    N, C, H, W = x.shape
    HW = H * W
    G = params["groups"]
    gsize = C // G

    x_flat = x.reshape(N, C, HW).astype(jnp.float32)

    # Group-averaging matrix: 1/(gsize*HW) inside each group; turns per-channel sums into
    # per-group means with one small matmul (no reshapes across the (8,128) tile layout).
    gi = jnp.arange(C) // gsize
    amat = (gi[:, None] == gi[None, :]).astype(jnp.float32) / float(gsize * HW)

    # Fold 1/sqrt(C) and GroupNorm-1's affine into the 1x1 conv (all f32, trace-time only):
    #   y = W @ (xn_raw*gamma1 + beta1)/sqrt(C) + b
    #     = (W*gamma1^T/sqrt(C)) @ xn_raw + ((W/sqrt(C)) @ beta1 + b)
    inv_sqrt_c = 1.0 / float(C) ** 0.5
    w_f32 = params["wconv"].astype(jnp.float32) * inv_sqrt_c                       # (C, C)
    g1 = params["gamma1"].astype(jnp.float32)
    b1 = params["beta1"].astype(jnp.float32)
    wconv = (w_f32 * g1[None, :]).astype(MATMUL_DTYPE)                             # (C, C) bf16
    bconv = (w_f32 @ b1 + params["bconv"].astype(jnp.float32)).reshape(C, 1)       # (C, 1) f32
    g2 = params["gamma2"].reshape(C, 1).astype(jnp.float32)
    b2 = params["beta2"].reshape(C, 1).astype(jnp.float32)

    # VMEM budget: x/out (C,HW) f32 blocks are double-buffered by the pipeline plus a couple of
    # live intermediates; cap below v7x's 64 MiB physical VMEM (v6e/v5e have 128 MiB).
    block_bytes = C * HW * 4
    vmem_need = 6 * block_bytes + 3 * C * C * 4 + 16 * C * 4 + (1 << 20)
    vmem_limit = int(min(max(vmem_need, 32 * 2 ** 20), 60 * 2 ** 20))
    # TODO(synk): for very large C*HW (v7x 64 MiB VMEM) add an HW grid axis with a two-pass
    # GroupNorm accumulator; full-image spatial blocks are the right choice at these sizes.

    param2d = lambda shape: pl.BlockSpec(shape, lambda n: (0, 0))  # constant block index ->
    # Pallas skips re-DMA of the (tiny) parameter blocks after the first grid step.

    out_flat = pl.pallas_call(
        class_attn_kernel,
        out_shape=jax.ShapeDtypeStruct((N, C, HW), jnp.float32),
        grid=(N,),
        in_specs=[
            pl.BlockSpec((None, C, HW), lambda n: (n, 0, 0)),   # x (batch dim squeezed)
            param2d((C, C)),      # group-averaging matrix (f32)
            param2d((C, C)),      # wconv (bf16; 1/sqrt(C) and gamma1 folded in)
            param2d((C, 1)),      # bconv (beta1 contribution folded in)
            param2d((C, 1)),      # gamma2
            param2d((C, 1)),      # beta2
        ],
        out_specs=pl.BlockSpec((None, C, HW), lambda n: (n, 0, 0)),
        compiler_params=pltpu.CompilerParams(
            dimension_semantics=("parallel",),        # batch axis shards across v7x's 2 TCs
            vmem_limit_bytes=vmem_limit),
    )(x_flat, amat, wconv, bconv, g2, b2)

    return out_flat.reshape(N, C, H, W)


def reference(x, cls_vec, p):
    """Pure-JAX mirror of the full PyTorch forward (q/k/softmax path included) for verification."""
    N, C, H, W = x.shape
    G = p["groups"]

    def gn(z, gamma, beta):
        zr = z.reshape(N, G, (C // G) * H * W)
        mu = zr.mean(-1, keepdims=True)
        var = zr.var(-1, keepdims=True)
        zn = ((zr - mu) / jnp.sqrt(var + EPS)).reshape(N, C, H, W)
        return zn * gamma.reshape(1, C, 1, 1) + beta.reshape(1, C, 1, 1)

    xn = gn(x, p["gamma1"], p["beta1"])
    q = cls_vec @ p["wq"] + p["bq"]                            # (N, C)
    k = cls_vec @ p["wk"] + p["bk"]                            # (N, C)
    logits = q[:, :, None] * k[:, None, :]                     # (N, C, C)
    qk = jax.nn.softmax(logits, axis=-1) / jnp.sqrt(jnp.float32(C))
    scale = qk.sum(-1)                                         # (N, C)  == 1/sqrt(C)
    xs = xn * scale[:, :, None, None]
    y = jnp.einsum("oi,nihw->nohw", p["wconv"], xs) + p["bconv"].reshape(1, C, 1, 1)
    yn = gn(y, p["gamma2"], p["beta2"])
    return yn + x


if __name__ == "__main__":
    # Small shapes consistent with the module: x is NCHW with C == out_dim, cls is (N, cls_dim).
    N, cls_dim, out_dim, H, W = 2, 16, 8, 16, 16
    groups = out_dim // 4 if out_dim > 4 else 1

    key = jax.random.PRNGKey(0)
    ks = jax.random.split(key, 12)
    x = jax.random.normal(ks[0], (N, out_dim, H, W), jnp.float32)
    cls_vec = jax.random.normal(ks[1], (N, cls_dim), jnp.float32)

    params = {
        "groups": groups,
        "wq": 0.25 * jax.random.normal(ks[2], (cls_dim, out_dim), jnp.float32),
        "bq": 0.10 * jax.random.normal(ks[3], (out_dim,), jnp.float32),
        "wk": 0.25 * jax.random.normal(ks[4], (cls_dim, out_dim), jnp.float32),
        "bk": 0.10 * jax.random.normal(ks[5], (out_dim,), jnp.float32),
        "gamma1": 1.0 + 0.1 * jax.random.normal(ks[6], (out_dim,), jnp.float32),
        "beta1": 0.1 * jax.random.normal(ks[7], (out_dim,), jnp.float32),
        "wconv": 0.30 * jax.random.normal(ks[8], (out_dim, out_dim), jnp.float32),
        "bconv": 0.10 * jax.random.normal(ks[9], (out_dim,), jnp.float32),
        "gamma2": 1.0 + 0.1 * jax.random.normal(ks[10], (out_dim,), jnp.float32),
        "beta2": 0.1 * jax.random.normal(ks[11], (out_dim,), jnp.float32),
    }

    out = class_attn_forward(x, cls_vec, params)
    out = jax.block_until_ready(out)

    ref = jax.block_until_ready(reference(x, cls_vec, params))
    # Tolerance loosened from 1e-3 because the 1x1-conv matmul feeds the MXU bf16 inputs
    # (f32 accumulation); the reference keeps the conv entirely in f32.
    np.testing.assert_allclose(np.asarray(out), np.asarray(ref), rtol=2e-2, atol=2e-2)

    print("KERNEL_OK")
</pallas_src>

<mosaic_0001>
module attributes {stable_mosaic.version = 11 : i64} {
  func.func @class_attn_kernel(%arg0: i32, %arg1: memref<1x8x256xf32, #tpu.memory_space<vmem>>, %arg2: memref<8x8xf32, #tpu.memory_space<vmem>>, %arg3: memref<8x8xbf16, #tpu.memory_space<vmem>>, %arg4: memref<8x1xf32, #tpu.memory_space<vmem>>, %arg5: memref<8x1xf32, #tpu.memory_space<vmem>>, %arg6: memref<8x1xf32, #tpu.memory_space<vmem>>, %arg7: memref<1x8x256xf32, #tpu.memory_space<vmem>>) attributes {dimension_semantics = [#tpu.dimension_semantics<parallel>], iteration_bounds = array<i64: 2>, scalar_prefetch = 0 : i64, scratch_operands = 0 : i64, tpu.core_type = #tpu.core_type<tc>, window_params = [{transform_indices = @transform_0, window_bounds = array<i64: 1, 8, 256>}, {pipeline_mode = #tpu.pipeline_mode<synchronous>, transform_indices = @transform_1, window_bounds = array<i64: 8, 8>}, {pipeline_mode = #tpu.pipeline_mode<synchronous>, transform_indices = @transform_2, window_bounds = array<i64: 8, 8>}, {pipeline_mode = #tpu.pipeline_mode<synchronous>, transform_indices = @transform_3, window_bounds = array<i64: 8, 1>}, {pipeline_mode = #tpu.pipeline_mode<synchronous>, transform_indices = @transform_4, window_bounds = array<i64: 8, 1>}, {pipeline_mode = #tpu.pipeline_mode<synchronous>, transform_indices = @transform_5, window_bounds = array<i64: 8, 1>}, {transform_indices = @transform_6, window_bounds = array<i64: 1, 8, 256>}]} {
    %c0 = arith.constant 0 : index
    %c0_0 = arith.constant 0 : index
    %0 = vector.load %arg2[%c0, %c0_0] : memref<8x8xf32, #tpu.memory_space<vmem>>, vector<8x8xf32>
    %c0_1 = arith.constant 0 : index
    %c0_2 = arith.constant 0 : index
    %c0_3 = arith.constant 0 : index
    %1 = vector.load %arg1[%c0_1, %c0_2, %c0_3] : memref<1x8x256xf32, #tpu.memory_space<vmem>>, vector<1x8x256xf32>
    %2 = vector.shape_cast %1 : vector<1x8x256xf32> to vector<8x256xf32>
    %cst = arith.constant dense<0.000000e+00> : vector<8xf32>
    %3 = vector.multi_reduction <add>, %2, %cst [1] : vector<8x256xf32> to vector<8xf32>
    %4 = vector.shape_cast %3 : vector<8xf32> to vector<8x1xf32>
    %5 = arith.mulf %2, %2 : vector<8x256xf32>
    %cst_4 = arith.constant dense<0.000000e+00> : vector<8xf32>
    %6 = vector.multi_reduction <add>, %5, %cst_4 [1] : vector<8x256xf32> to vector<8xf32>
    %7 = vector.shape_cast %6 : vector<8xf32> to vector<8x1xf32>
    %8 = tpu.concatenate %4, %7 in 1 : vector<8x1xf32>, vector<8x1xf32> -> vector<8x2xf32>
    %cst_5 = arith.constant dense<0.000000e+00> : vector<8x2xf32>
    %9 = tpu.matmul %0, %8, %cst_5 {dimension_numbers = #tpu.dot_dimension_numbers<[1], [0], [0], [1], [0, 0, 1, 1], [], []>} : vector<8x8xf32>, vector<8x2xf32>, vector<8x2xf32> -> vector<8x2xf32>
    %10 = vector.extract_strided_slice %9 {offsets = [0, 0], sizes = [8, 1], strides = [1, 1]} : vector<8x2xf32> to vector<8x1xf32>
    %11 = vector.extract_strided_slice %9 {offsets = [0, 1], sizes = [8, 1], strides = [1, 1]} : vector<8x2xf32> to vector<8x1xf32>
    %12 = arith.mulf %10, %10 : vector<8x1xf32>
    %13 = arith.subf %11, %12 : vector<8x1xf32>
    %cst_6 = arith.constant 0.000000e+00 : f32
    %14 = vector.broadcast %cst_6 : f32 to vector<8x1xf32>
    %15 = arith.maximumf %13, %14 : vector<8x1xf32>
    %cst_7 = arith.constant 9.99999974E-6 : f32
    %16 = vector.broadcast %cst_7 : f32 to vector<8x1xf32>
    %17 = arith.addf %15, %16 : vector<8x1xf32>
    %18 = math.rsqrt %17 : vector<8x1xf32>
    %cst_8 = arith.constant 1.000000e+00 : f32
    %19 = vector.broadcast %cst_8 : f32 to vector<8x1xf32>
    %20 = arith.mulf %18, %19 : vector<8x1xf32>
    %21 = arith.mulf %10, %20 : vector<8x1xf32>
    %cst_9 = arith.constant 0.000000e+00 : f32
    %22 = vector.broadcast %cst_9 : f32 to vector<8x1xf32>
    %23 = arith.subf %22, %21 : vector<8x1xf32>
    %24 = vector.broadcast %20 : vector<8x1xf32> to vector<8x256xf32>
    %25 = arith.mulf %2, %24 : vector<8x256xf32>
    %26 = vector.broadcast %23 : vector<8x1xf32> to vector<8x256xf32>
    %27 = arith.addf %25, %26 : vector<8x256xf32>
    %c0_10 = arith.constant 0 : index
    %c0_11 = arith.constant 0 : index
    %28 = vector.load %arg3[%c0_10, %c0_11] : memref<8x8xbf16, #tpu.memory_space<vmem>>, vector<8x8xbf16>
    %29 = arith.truncf %27 : vector<8x256xf32> to vector<8x256xbf16>
    %cst_12 = arith.constant dense<0.000000e+00> : vector<8x256xf32>
    %30 = tpu.matmul %28, %29, %cst_12 {dimension_numbers = #tpu.dot_dimension_numbers<[1], [0], [0], [1], [0, 0, 1, 1], [], []>} : vector<8x8xbf16>, vector<8x256xbf16>, vector<8x256xf32> -> vector<8x256xf32>
    %c0_13 = arith.constant 0 : index
    %c0_14 = arith.constant 0 : index
    %31 = vector.load %arg4[%c0_13, %c0_14] : memref<8x1xf32, #tpu.memory_space<vmem>>, vector<8x1xf32>
    %32 = vector.broadcast %31 : vector<8x1xf32> to vector<8x256xf32>
    %33 = arith.addf %30, %32 : vector<8x256xf32>
    %c0_15 = arith.constant 0 : index
    %c0_16 = arith.constant 0 : index
    %34 = vector.load %arg5[%c0_15, %c0_16] : memref<8x1xf32, #tpu.memory_space<vmem>>, vector<8x1xf32>
    %c0_17 = arith.constant 0 : index
    %c0_18 = arith.constant 0 : index
    %35 = vector.load %arg6[%c0_17, %c0_18] : memref<8x1xf32, #tpu.memory_space<vmem>>, vector<8x1xf32>
    %cst_19 = arith.constant dense<0.000000e+00> : vector<8xf32>
    %36 = vector.multi_reduction <add>, %33, %cst_19 [1] : vector<8x256xf32> to vector<8xf32>
    %37 = vector.shape_cast %36 : vector<8xf32> to vector<8x1xf32>
    %38 = arith.mulf %33, %33 : vector<8x256xf32>
    %cst_20 = arith.constant dense<0.000000e+00> : vector<8xf32>
    %39 = vector.multi_reduction <add>, %38, %cst_20 [1] : vector<8x256xf32> to vector<8xf32>
    %40 = vector.shape_cast %39 : vector<8xf32> to vector<8x1xf32>
    %41 = tpu.concatenate %37, %40 in 1 : vector<8x1xf32>, vector<8x1xf32> -> vector<8x2xf32>
    %cst_21 = arith.constant dense<0.000000e+00> : vector<8x2xf32>
    %42 = tpu.matmul %0, %41, %cst_21 {dimension_numbers = #tpu.dot_dimension_numbers<[1], [0], [0], [1], [0, 0, 1, 1], [], []>} : vector<8x8xf32>, vector<8x2xf32>, vector<8x2xf32> -> vector<8x2xf32>
    %43 = vector.extract_strided_slice %42 {offsets = [0, 0], sizes = [8, 1], strides = [1, 1]} : vector<8x2xf32> to vector<8x1xf32>
    %44 = vector.extract_strided_slice %42 {offsets = [0, 1], sizes = [8, 1], strides = [1, 1]} : vector<8x2xf32> to vector<8x1xf32>
    %45 = arith.mulf %43, %43 : vector<8x1xf32>
    %46 = arith.subf %44, %45 : vector<8x1xf32>
    %cst_22 = arith.constant 0.000000e+00 : f32
    %47 = vector.broadcast %cst_22 : f32 to vector<8x1xf32>
    %48 = arith.maximumf %46, %47 : vector<8x1xf32>
    %cst_23 = arith.constant 9.99999974E-6 : f32
    %49 = vector.broadcast %cst_23 : f32 to vector<8x1xf32>
    %50 = arith.addf %48, %49 : vector<8x1xf32>
    %51 = math.rsqrt %50 : vector<8x1xf32>
    %52 = arith.mulf %51, %34 : vector<8x1xf32>
    %53 = arith.mulf %43, %52 : vector<8x1xf32>
    %54 = arith.subf %35, %53 : vector<8x1xf32>
    %55 = vector.broadcast %52 : vector<8x1xf32> to vector<8x256xf32>
    %56 = arith.mulf %33, %55 : vector<8x256xf32>
    %c0_24 = arith.constant 0 : index
    %c0_25 = arith.constant 0 : index
    %c0_26 = arith.constant 0 : index
    %57 = vector.load %arg1[%c0_24, %c0_25, %c0_26] : memref<1x8x256xf32, #tpu.memory_space<vmem>>, vector<1x8x256xf32>
    %58 = vector.shape_cast %57 : vector<1x8x256xf32> to vector<8x256xf32>
    %59 = vector.broadcast %54 : vector<8x1xf32> to vector<8x256xf32>
    %60 = arith.addf %59, %58 : vector<8x256xf32>
    %61 = arith.addf %56, %60 : vector<8x256xf32>
    %c0_27 = arith.constant 0 : index
    %c0_28 = arith.constant 0 : index
    %c0_29 = arith.constant 0 : index
    %62 = vector.load %arg7[%c0_27, %c0_28, %c0_29] : memref<1x8x256xf32, #tpu.memory_space<vmem>>, vector<1x8x256xf32>
    %63 = vector.shape_cast %62 : vector<1x8x256xf32> to vector<8x256xf32>
    %64 = vector.shape_cast %61 : vector<8x256xf32> to vector<1x8x256xf32>
    tpu.vector_store %arg7[%c0_27, %c0_28, %c0_29], %64 {strides = array<i32>} : memref<1x8x256xf32, #tpu.memory_space<vmem>>, vector<1x8x256xf32>,
    return
  }
  func.func @transform_0(%arg0: i32) -> (i32, i32, i32) {
    %c0_i32 = arith.constant 0 : i32
    %c0_i32_0 = arith.constant 0 : i32
    %c0_i32_1 = arith.constant 0 : i32
    return %arg0, %c0_i32, %c0_i32_0 : i32, i32, i32
  }
  func.func @transform_1(%arg0: i32) -> (i32, i32) {
    %c0_i32 = arith.constant 0 : i32
    %c0_i32_0 = arith.constant 0 : i32
    %c0_i32_1 = arith.constant 0 : i32
    return %c0_i32, %c0_i32_0 : i32, i32
  }
  func.func @transform_2(%arg0: i32) -> (i32, i32) {
    %c0_i32 = arith.constant 0 : i32
    %c0_i32_0 = arith.constant 0 : i32
    %c0_i32_1 = arith.constant 0 : i32
    return %c0_i32, %c0_i32_0 : i32, i32
  }
  func.func @transform_3(%arg0: i32) -> (i32, i32) {
    %c0_i32 = arith.constant 0 : i32
    %c0_i32_0 = arith.constant 0 : i32
    %c0_i32_1 = arith.constant 0 : i32
    return %c0_i32, %c0_i32_0 : i32, i32
  }
  func.func @transform_4(%arg0: i32) -> (i32, i32) {
    %c0_i32 = arith.constant 0 : i32
    %c0_i32_0 = arith.constant 0 : i32
    %c0_i32_1 = arith.constant 0 : i32
    return %c0_i32, %c0_i32_0 : i32, i32
  }
  func.func @transform_5(%arg0: i32) -> (i32, i32) {
    %c0_i32 = arith.constant 0 : i32
    %c0_i32_0 = arith.constant 0 : i32
    %c0_i32_1 = arith.constant 0 : i32
    return %c0_i32, %c0_i32_0 : i32, i32
  }
  func.func @transform_6(%arg0: i32) -> (i32, i32, i32) {
    %c0_i32 = arith.constant 0 : i32
    %c0_i32_0 = arith.constant 0 : i32
    %c0_i32_1 = arith.constant 0 : i32
    return %arg0, %c0_i32, %c0_i32_0 : i32, i32, i32
  }
}

</mosaic_0001>

<bundles_post_ra>
// kernel: tpu_custom_call.1
= control target key start
LH: loop header
LB: loop body
LE: loop exit
PB: predicated region body
PF: predicated region fallthrough
CT: control target
= control target key end

     0   :  { %11 = vsyncpa [#allocation3], 0  ;;  %s1091_s0 = inlined_call_operand.hbm [shape: f32[2,8,256], index: 0, kind: input, shape index: {}]   ;;  %s1092_s1 = inlined_call_operand.vmem [shape: f32[8,8], index: 1, kind: input, shape index: {}]   ;;  %s1093_s2 = inlined_call_operand.vmem [shape: bf16[8,8], index: 2, kind: input, shape index: {}]   ;;  %s1094_s3 = inlined_call_operand.vmem [shape: f32[8,1], index: 3, kind: input, shape index: {}]   ;;  %s1095_s4 = inlined_call_operand.vmem [shape: f32[8,1], index: 4, kind: input, shape index: {}]   ;;  %s1096_s5 = inlined_call_operand.vmem [shape: f32[8,1], index: 5, kind: input, shape index: {}]   ;;  %s1097_s6 = inlined_call_operand.hbm [shape: f32[2,8,256], index: 6, kind: output, shape index: {}]  }
   0x1   :  { %13 = vsyncpa [#allocation3 + $0x1], 0 }
   0x2   :  { %14 = vsyncpa [#allocation4], 0 }
   0x3   :  { %16 = vsyncpa [#allocation4 + $0x1], 0  ;;  %s883_s21 = smov 0   ;;  %s885_s22 = smov 0  }
   0x4   :  { %s887_s23 = smov 0   ;;  %s889_s24 = smov 0  }
   0x5 LB: > { %s904_s25 = sadd.s32 4294967295, %s838_s24   ;;  %s647_s26 = sadd.s32 4294967294, %s838_s24   ;;  %s838_s24 = sphi %s889_s24, %s1112_s24   ;;  %s834_s23 = sphi %s887_s23, %s1111_s23   ;;  %s830_s22 = sphi %s885_s22, %s1110_s22   ;;  %s826_s21 = sphi %s883_s21, %s1109_s21  }
   0x6   : > { %s908_s27 = sadd.s32 1, %s838_s24   ;;  %s29_s28 = sadd.s32 1, %s834_s23 }
   0x7   : > { %s26_s29 = ssub.s32 %s838_s24, %s908_s27  ;;  %p36_p0 = scmp.ne.s32.totalorder %s834_s23, %s830_s22 }
   0x8   : > { %p27_p1 = scmp.eq.s32.totalorder %s26_s29, 0  ;;  %p37_p2 = scmp.eq.s32.totalorder %s838_s24, 0 }
   0x9   : > { %p42_p3 = scmp.ne.s32.totalorder %s830_s22, %s826_s21  ;;  %p43_p4 = scmp.eq.s32.totalorder %s904_s25, 0 }
   0xa   : > { %s920_s30 = scalar_select %p27_p1, %s834_s23, %s29_s28  }
   0xb   : > { %p922_p5 = por %p37_p2, %p36_p0  ;;  %p926_p6 = por %p43_p4, %p42_p3 }
   0xc   : > { %p171_p7 = scmp.eq.s32.totalorder %s904_s25, 1  ;;  %p177_p8 = scmp.eq.s32.totalorder %s647_s26, 1 }
   0xd   : > { %p693_p10 = scmp.lt.s32.totalorder %s838_s24, 2  ;;  %s212_s11 = sand.u32 1, %s834_s23  }
   0xe   : > { %p933_p11 = por %p171_p7, %p36_p0  ;;  %p937_p12 = por %p177_p8, %p42_p3 }
   0xf   : > { %s665_s12 = sshll.u32 %s838_s24, 8  ;;  %s650_s13 = sshll.u32 %s212_s11, 4 }
  0x10   : > { %s1101_s9 = scalar_select %p933_p11, 1, 0 }
  0x11   : > { %s1102_s10 = scalar_select %p937_p12, 1, 0 }
  0x12   : > { %s946_s16 = scalar_lea.hbm %s1091_s0, %s665_s12  ;;  %s216_s17 = scalar_lea.vmem [#allocation2], %s650_s13 }
  0x13   : > { %s224_s18 = sshll.u32 %s216_s17, 4  ;;  %p950_p13 = pnand %p693_p10, %p922_p5  ;;  %s954_s18 = int_to_ptr.vmem [resolvable:$true] %s224_s18 }
  0x14   : > { %s213_s20 = scalar_lea.sflag [#allocation3], %s212_s11  ;;  %s742_s26 = scalar_lea.hbm %s946_s16, 256 }
  0x15   : > { %p743_p2 = scmp.ne.s32.totalorder %s946_s16, %s742_s26  ;;  %p744_p3 = pneg %p950_p13 }
  0x16   : > { %s747_s7 = scalar_lea.hbm %s1091_s0, 512  ;;  %p748_p5 = scmp.lt.u32.totalorder %s946_s16, %s1091_s0 }
  0x17   : > { %p745_p4 = pnand %p744_p3, %p743_p2  ;;  %p749_p8 = scmp.lt.u32.totalorder %s747_s7, %s742_s26 }
  0x18   : > { %p751_p9 = scmp.lt.u32.totalorder %s742_s26, %s946_s16 }
  0x19   : > { %p746_p7 = pneg %p745_p4  ;;  %p750_p10 = por %p749_p8, %p748_p5 }
  0x1b   : > { %p752_p0 = por %p751_p9, %p750_p10 }
  0x1d   : > { %p753_p1 = pnand %p752_p0, %p746_p7 }
  0x1f   : > { %756 = shalt.err (!%p753_p1)
}
  0x20   : > { %s757_s11 = scalar_lea.vmem %s954_s18, 256  ;;  %s840_s14 = smov [#allocation2]  }
  0x21   : > { %p758_p2 = scmp.ne.s32.totalorder %s954_s18, %s757_s11  ;;  %s762_s15 = sshll.u32 %s840_s14, 4  ;;  %s763_s15 = int_to_ptr.vmem [resolvable:$false] %s762_s15 }
  0x22   : > { %s764_s17 = scalar_lea.vmem %s763_s15, 512  ;;  %p765_p11 = scmp.lt.s32.totalorder %s954_s18, %s763_s15 }
  0x23   : > { %p760_p4 = pnand %p758_p2, %p744_p3  ;;  %p766_p5 = scmp.lt.s32.totalorder %s764_s17, %s757_s11 }
  0x25   : > { %p761_p12 = pneg %p760_p4  ;;  %p767_p8 = por %p766_p5, %p765_p11 }
  0x27   : > { %p768_p9 = pnand %p767_p8, %p761_p12 }
  0x29   : > { %771 = shalt.err (!%p768_p9)
}
  0x2a   : > { %688 = dma.hbm_to_vmem [thread:$0]  (!%p950_p13), %s946_s16, 256, %s954_s18, %s213_s20  }
  0x2b   : > { %p1104_p0 = scmp.lt.s32.totalorder %s838_s24, 3  ;;  %p1105_p1 = scmp.ge.s32.totalorder %s838_s24, 1 }
  0x2d   : > { %p230_p3 = pnand %p1105_p1, %p1104_p0 }
  0x2e   : > { %s988_s26 = sand.u32 (!%p230_p3), 1, %s830_s22  }
  0x2f   : > { %233 = sbr.rel (%p230_p3) target bundleno = 1783 (0x6f7), region = 44  ;;  %s654_s28 = sshll.u32 (!%p230_p3), %s988_s26, 4 }
  0x30   : > { %s236_s29 = scalar_lea.sflag (!%p230_p3), [#allocation3], %s988_s26  ;;  %s239_s19 = scalar_lea.vmem (!%p230_p3), [#allocation2], %s654_s28 }
  0x36   : > { %817 = dma.done.wait (%p926_p6), %s236_s29, 256  }
  0x37   : > { %819 = vsyncadd (%p926_p6), %s236_s29, 4294967040  ;;  %v998_v0 = vld [vmem:[%s239_s19] sm:$0xff]  ;;  %v1000_v1 = vld [vmem:[%s239_s19 + $0x8] sm:$0xff]  ;;  %v841_v6 = vmov 0.0   ;;  %vm842_vm0 = vmmov 0   ;;  %vm280_vm1 = vcmask 7168  }
  0x38   : > { %v272_v2 = vadd.f32 %v1000_v1, %v998_v0  ;;  %v275_v3 = vmul.f32 %v998_v0, %v998_v0  ;;  %v276_v4 = vmul.f32 %v1000_v1, %v1000_v1  ;;  %671 = vmatprep.subr.mxu0 %v841_v6  ;;  %673 = vmatprep.mubr.msk.f32.mxu0 %vm842_vm0, %v841_v6  ;;  %v1011_v9 = vld [vmem:[%s1092_s1] sm:$0xff]  ;;  %vm282_vm2 = vcmask 64512   ;;  %s844_s18 = smov 1   ;;  %s846_s20 = smov 127  }
  0x39   : > { %v843_v11 = vmov 1   ;;  %v845_v19 = vmov 0   ;;  %v387_v24 = vld [vmem:[%s1094_s3] sm:$0xff]  ;;  %vm396_vm3 = vcmask 1043456   ;;  %s666_s19 = sshll.u32 %s904_s25, 8  ;;  %s267_s8 = scalar_lea.vmem [#allocation5], %s654_s28 }
  0x3a   : > { %273 = vadd.xlane.f32.xlu0 %v272_v2  ;;  %v277_v5 = vadd.f32 %v276_v4, %v275_v3  ;;  %734 = vset.pattern.permute.xlu1 %v845_v19  ;;  %v384_v34 = vld [vmem:[%s1093_s2] sm:$0xf]  ;;  %s577_s16 = sshll.u32 %s267_s8, 4  ;;  %s1047_s7 = scalar_lea.hbm %s1097_s6, %s666_s19  ;;  %s1049_s16 = int_to_ptr.vmem [resolvable:$true] %s577_s16 }
  0x3b   : > { %733 = vset.pattern.permute.xlu0 %v843_v11  ;;  %435 = vmatprep.mubr.bf16.mxu1 %v845_v19  ;;  %v444_v52 = vld [vmem:[%s1095_s4] sm:$0xff]  ;;  %s563_s25 = scalar_lea.sflag [#allocation4], %s988_s26  ;;  %s772_s28 = scalar_lea.vmem %s1049_s16, 256 }
  0x3c   : > { %v445_v60 = vld [vmem:[%s1096_s5] sm:$0xff]  ;;  %p773_p6 = scmp.ne.s32.totalorder %s1049_s16, %s772_s28  ;;  %p1106_p11 = scmp.ne.s32.totalorder %s1101_s9, 0 }
  0x3d   : > { %s847_s12 = smov [#allocation5]  }
  0x3e   : > { %278 = vadd.xlane.f32.xlu0 %v277_v5  ;;  %p774_p12 = pnand %p773_p6, %p1106_p11  ;;  %s776_s13 = sshll.u32 %s847_s12, 4  ;;  %s777_s13 = int_to_ptr.vmem [resolvable:$false] %s776_s13 }
  0x3f   : > { %s778_s11 = scalar_lea.vmem %s777_s13, 512  ;;  %p779_p7 = scmp.lt.s32.totalorder %s1049_s16, %s777_s13 }
  0x40   : > { %p775_p13 = pneg %p774_p12  ;;  %p780_p10 = scmp.lt.s32.totalorder %s778_s11, %s772_s28 }
  0x42   : > { %p781_p2 = por %p780_p10, %p779_p7 }
  0x44   : > { %p782_p4 = pnand %p781_p2, %p775_p13 }
  0xc7   : > { %v274_v7 = vpop.xlane.xlu0 %273 }
  0xcb   : > { %v279_v8 = vpop.xlane.xlu0 %278 }
  0xcc   : > { %v281_v10 = vsel %vm280_vm1, %v274_v7, %v279_v8 }
  0xcd   : > { %672 = vmatpush3.msra.mxu0 %v281_v10 }
  0xce   : > { %674 = vmatmul.mubr.msk.f32.vlgmr.msra.gmra.mrb[0].mxu0 %vm282_vm2, %v1011_v9  ;;  %676 = vmatprep.subr.mxu0 %v841_v6 }
  0xcf   : > { %678 = vmatprep.mubr.msk.f32.mxu0 %vm842_vm0, %v841_v6 }
 0x1a1   : > { %v352_v12 = vpop.f32.mrb[0].mxu0 }
 0x1a2   : > { %v675_v13 = vpop.f32.mrb[1].mxu0  ;;  %v356_v14 = vmul.f32 %v352_v12, %v352_v12 }
 0x1a4   : > { %358 = vrot.lane.b32.xlu1 %v356_v14, %s844_s18 }
 0x216   : > { %v359_v15 = vpop.permute.xlu1 %358 }
 0x217   : > { %v361_v16 = vsub.f32 %v352_v12, %v359_v15 }
 0x219   : > { %v362_v17 = vmax.f32 %v361_v16, 0.0 }
 0x21b   : > { %v363_v18 = vadd.f32 1e-05, %v362_v17 }
 0x21d   : > { %738 = vrsqrt.f32 %v363_v18 }
 0x227   : > { %v739_v20 = vpop.eup %738 }
 0x228   : > { %372 = vperm.xlu0 %733, %v739_v20   ;;  %366 = vrot.lane.b32.xlu1 %v739_v20, %s846_s20 }
 0x22c   : > { %737 = vset.pattern.permute.xlu0 %v845_v19 }
 0x29a   : > { %v367_v21 = vpop.permute.xlu1 %366 }
 0x29b   : > { %v369_v22 = vmul.f32 %v367_v21, %v352_v12 }
 0x29d   : > { %v370_v23 = vsub.f32 0.0, %v369_v22 }
 0x29f   : > { %379 = vperm.xlu1 %734, %v370_v23  }
 0x2a3   : > { %390 = vperm.xlu1 %734, %v387_v24  }
 0x2a7   : > { %735 = vset.pattern.permute.xlu1 %v843_v11  ;;  %v373_v25 = vpop.permute.xlu0 %372 }
 0x2a8   : > { %v375_v26 = vmul.f32 %v373_v25, %v998_v0  ;;  %v376_v27 = vmul.f32 %v373_v25, %v1000_v1 }
 0x31e   : > { %v380_v28 = vpop.permute.xlu1 %379 }
 0x31f   : > { %v382_v29 = vadd.f32 %v380_v28, %v375_v26  ;;  %v383_v30 = vadd.f32 %v380_v28, %v376_v27 }
 0x321   : > { %v385_v31 = vpack.c.bf16 %v382_v29, %v382_v29  ;;  %v386_v32 = vpack.c.bf16 %v383_v30, %v383_v30 }
 0x322   : > { %v391_v35 = vpop.permute.xlu1 %390 }
 0x323   : > { %657 = vmatprep.subr.msk.bf16.mxu1 %vm396_vm3, %v386_v32  ;;  %v398_v33 = vsel %vm396_vm3, %v385_v31, 0 }
 0x324   : > { %404 = vmatpush1.bf16.msra.mxu1 %v398_v33 }
 0x327   : > { %658 = vmatmul.mubr.msk.bf16.vlgmr.msra.gmra.mrb[0].mxu1 %vm282_vm2, %v384_v34 }
 0x3fa   : > { %v437_v36 = vpop.f32.mrb[0].mxu1 }
 0x3fb   : > { %v438_v37 = vadd.f32 %v437_v36, %v391_v35  ;;  %v439_v38 = vpop.f32.mrb[1].mxu1 }
 0x3fc   : > { %v440_v39 = vadd.f32 %v439_v38, %v391_v35  ;;  %v441_v40 = vpop.f32.mrb[2].mxu1 }
 0x3fd   : > { %v442_v41 = vpop.f32.mrb[3].mxu1  ;;  %v449_v42 = vmul.f32 %v438_v37, %v438_v37 }
 0x3fe   : > { %v446_v43 = vadd.f32 %v440_v39, %v438_v37  ;;  %v450_v44 = vmul.f32 %v440_v39, %v440_v39 }
 0x400   : > { %447 = vadd.xlane.f32.xlu1 %v446_v43  ;;  %v451_v45 = vadd.f32 %v450_v44, %v449_v42 }
 0x402   : > { %452 = vadd.xlane.f32.xlu0 %v451_v45 }
 0x48d   : > { %v448_v46 = vpop.xlane.xlu1 %447 }
 0x48f   : > { %v453_v47 = vpop.xlane.xlu0 %452 }
 0x490   : > { %v454_v48 = vsel %vm280_vm1, %v448_v46, %v453_v47 }
 0x491   : > { %677 = vmatpush3.msra.mxu0 %v454_v48 }
 0x492   : > { %679 = vmatmul.mubr.msk.f32.vlgmr.msra.gmra.mrb[2].mxu0 %vm282_vm2, %v1011_v9 }
 0x565   : > { %v521_v49 = vpop.f32.mrb[2].mxu0 }
 0x566   : > { %v525_v50 = vmul.f32 %v521_v49, %v521_v49  ;;  %v680_v51 = vpop.f32.mrb[3].mxu0 }
 0x568   : > { %527 = vrot.lane.b32.xlu1 %v525_v50, %s844_s18 }
 0x56c   : > { %535 = vrot.lane.b32.xlu1 %v444_v52, %s844_s18 }
 0x5da   : > { %v528_v53 = vpop.permute.xlu1 %527 }
 0x5db   : > { %v530_v54 = vsub.f32 %v521_v49, %v528_v53 }
 0x5dd   : > { %v531_v55 = vmax.f32 %v530_v54, 0.0 }
 0x5de   : > { %v536_v57 = vpop.permute.xlu1 %535 }
 0x5df   : > { %v532_v56 = vadd.f32 1e-05, %v531_v55 }
 0x5e1   : > { %740 = vrsqrt.f32 %v532_v56 }
 0x5eb   : > { %v741_v58 = vpop.eup %740 }
 0x5ec   : > { %v538_v59 = vmul.f32 %v741_v58, %v536_v57 }
 0x5ee   : > { %540 = vrot.lane.b32.xlu1 %v538_v59, %s846_s20 }
 0x5f2   : > { %546 = vperm.xlu1 %735, %v538_v59  }
 0x5f6   : > { %736 = vset.pattern.permute.xlu1 %v845_v19 }
 0x660   : > { %v541_v61 = vpop.permute.xlu1 %540 }
 0x661   : > { %v543_v62 = vmul.f32 %v541_v61, %v521_v49 }
 0x663   : > { %v544_v63 = vsub.f32 %v445_v60, %v543_v62 }
 0x665   : > { %553 = vperm.xlu1 %736, %v544_v63  }
 0x671   : > { %v547_v2 = vpop.permute.xlu1 %546 }
 0x672   : > { %v549_v4 = vmul.f32 %v547_v2, %v438_v37  ;;  %v550_v5 = vmul.f32 %v547_v2, %v440_v39 }
 0x6e4   : > { %v554_v3 = vpop.permute.xlu1 %553 }
 0x6e5   : > { %v556_v6 = vadd.f32 %v554_v3, %v998_v0  ;;  %v557_v7 = vadd.f32 %v554_v3, %v1000_v1 }
 0x6e7   : > { %v558_v8 = vadd.f32 %v556_v6, %v549_v4  ;;  %v559_v9 = vadd.f32 %v557_v7, %v550_v5 }
 0x6e9   : > { %560 = vst [vmem:[%s267_s8] sm:$0xff] %v558_v8  ;;  %561 = vst [vmem:[%s267_s8 + $0x8] sm:$0xff] %v559_v9 }
 0x6ea   : > { %785 = shalt.err (!%p782_p4)
}
 0x6eb   : > { %s786_s26 = scalar_lea.hbm %s1047_s7, 256  ;;  %s790_s17 = scalar_lea.hbm %s1097_s6, 512 }
 0x6ec   : > { %p787_p5 = scmp.ne.s32.totalorder %s1047_s7, %s786_s26  ;;  %p791_p0 = scmp.lt.u32.totalorder %s1047_s7, %s1097_s6 }
 0x6ed   : > { %p792_p1 = scmp.lt.u32.totalorder %s790_s17, %s786_s26  ;;  %p794_p6 = scmp.lt.u32.totalorder %s786_s26, %s1047_s7 }
 0x6ee   : > { %p788_p8 = pnand %p787_p5, %p1106_p11 }
 0x6ef   : > { %p793_p3 = por %p792_p1, %p791_p0 }
 0x6f0   : > { %p789_p9 = pneg %p788_p8 }
 0x6f1   : > { %p795_p12 = por %p794_p6, %p793_p3 }
 0x6f3   : > { %p796_p13 = pnand %p795_p12, %p789_p9 }
 0x6f5   : > { %799 = shalt.err (!%p796_p13)
}
 0x6f6   : > { %683 = dma.vmem_to_hbm [thread:$0]  (%p1106_p11), %s1049_s16, 256, %s1047_s7, %s563_s25  }
 0x6f7 PF: > { %s589_s8 = sand.u32 1, %s826_s21   ;;  %p1107_p7 = scmp.ne.s32.totalorder %s1102_s10, 0 }
 0x6f8   : > { %p1108_p10 = scmp.ge.s32.totalorder %s838_s24, 2  ;;  %s590_s18 = scalar_lea.sflag [#allocation4], %s589_s8 }
 0x6fa   : > { %p690_p2 = pnand %p1108_p10, %p1107_p7 }
 0x6fc   : > { %821 = dma.done.wait (!%p690_p2), %s590_s18, 256  }
 0x6fd   : > { %823 = vsyncadd (!%p690_p2), %s590_s18, 4294967040  ;;  %p19_p4 = scmp.ge.s32.totalorder %s908_s27, 4   ;;  %s1109_s21 = smov %s830_s22 }
 0x6fe   : > { %s1110_s22 = smov %s834_s23  ;;  %s1111_s23 = smov %s920_s30 }
 0x6ff   : > { %s1112_s24 = smov %s908_s27  ;;  %21 = sbr.rel (!%p19_p4) target bundleno = 5 (0x5), region = 89 }
 0x706   :  { %595 = vsyncpa [#allocation3], 1 }
 0x707   :  { %597 = vsyncpa [#allocation3 + $0x1], 1 }
 0x708   :  { %598 = vsyncpa [#allocation4], 1 }
 0x709   :  { %600 = vsyncpa [#allocation4 + $0x1], 1 }

</bundles_post_ra>
